<compile_context>
chip_gen: v6e
topology: v6e:2x2x1
jax: 0.10.0
libtpu: 0.0.40
codegen_flags: <defaults>
</compile_context>

<pallas_src>
import math

import jax
import jax.numpy as jnp
from jax.experimental import pallas as pl
from jax.experimental.pallas import tpu as pltpu


# ----------------------------------------------------------------------------
# Pallas kernel: out = xp @ W_blockdiag + temp @ J + pos      (fused, f32 acc)
# ----------------------------------------------------------------------------
def _patch_embed_kernel(xp_ref, w_ref, pos_ref, temp_ref, j_ref, o_ref):
    # xp_ref  : (tm, V*K)     patch rows, vars folded into lanes      (streamed)
    # w_ref   : (V*K, VDp)    block-diagonal value-embedding weight   (resident)
    # pos_ref : (1,  VDp)     per-var positional embedding, flat      (resident)
    # temp_ref: (tm, D)       per-row temporal embedding              (streamed)
    # j_ref   : (D,  VDp)     horizontally tiled identity             (resident)
    # o_ref   : (tm, VDp)     lane-dense output slab
    val = jnp.dot(xp_ref[...], w_ref[...], preferred_element_type=jnp.float32)
    val = val + jnp.dot(temp_ref[...], j_ref[...], preferred_element_type=jnp.float32)
    o_ref[...] = (val + pos_ref[...].astype(jnp.float32)).astype(o_ref.dtype)


# ----------------------------------------------------------------------------
# Tiling / VMEM budgeting helpers
# ----------------------------------------------------------------------------
def _round_up(x, m):
    return ((x + m - 1) // m) * m


def _vmem_capacity_bytes():
    try:
        return int(pltpu.get_tpu_info().vmem_capacity_bytes)
    except Exception:
        return 64 << 20  # conservative fallback (v7x per-TensorCore VMEM)


def _choose_tm(m, vk, d, vd_pad, in_bytes, out_bytes, resident_bytes, cap):
    """Largest row tile (sublane-aligned) whose double-buffered streamed working
    set fits the generation-aware VMEM budget, with >=2 grid steps for large M."""
    sub = 16 if in_bytes < 4 else 8                      # bf16 sublane packing
    target = 2048 if cap >= (96 << 20) else 1024         # bigger tiles on 128 MiB parts
    budget = max(4 << 20, cap // 2 - resident_bytes)     # headroom + resident charged
    per_row = 2 * ((vk + d) * in_bytes + vd_pad * out_bytes)   # double-buffered streams
    tm_cap = max(sub, (budget // per_row) // sub * sub)
    m_r = _round_up(m, sub)
    tm_target = max(sub, min(target, tm_cap, m_r))
    nsteps = pl.cdiv(m_r, tm_target)
    if nsteps == 1 and m_r >= 256:                       # keep both v7x TCs busy
        nsteps = 2
    tm = _round_up(pl.cdiv(m_r, nsteps), sub)
    return int(min(tm, tm_cap))


def patch_embed_matmul(xp2, w_blk, pos_flat, temp, j_mat, *,
                       out_dtype=jnp.float32, tm=None):
    m, vk = xp2.shape
    d = temp.shape[1]
    vd_pad = w_blk.shape[1]
    in_bytes = jnp.dtype(xp2.dtype).itemsize
    out_bytes = jnp.dtype(out_dtype).itemsize
    w_bytes = jnp.dtype(w_blk.dtype).itemsize
    # Resident operands (conservatively assume 2 buffers for the budget).
    resident_bytes = 2 * (vk * vd_pad + d * vd_pad + vd_pad) * w_bytes
    cap = _vmem_capacity_bytes()
    if tm is None:
        tm = _choose_tm(m, vk, d, vd_pad, in_bytes, out_bytes, resident_bytes, cap)
    nsteps = pl.cdiv(m, tm)
    work_bytes = 2 * tm * ((vk + d) * in_bytes + vd_pad * out_bytes) + resident_bytes
    vmem_limit = int(min(cap, max(32 << 20, work_bytes + (4 << 20))))

    def _run(single_buffer_resident):
        res_kw = ({"pipeline_mode": pl.Buffered(1)}
                  if single_buffer_resident else {})
        in_specs = [
            pl.BlockSpec((tm, vk), lambda i: (i, 0)),               # patch rows
            pl.BlockSpec((vk, vd_pad), lambda i: (0, 0), **res_kw), # weight (resident)
            pl.BlockSpec((1, vd_pad), lambda i: (0, 0), **res_kw),  # positional
            pl.BlockSpec((tm, d), lambda i: (i, 0)),                # temporal rows
            pl.BlockSpec((d, vd_pad), lambda i: (0, 0), **res_kw),  # tiled identity
        ]
        return pl.pallas_call(
            _patch_embed_kernel,
            out_shape=jax.ShapeDtypeStruct((m, vd_pad), out_dtype),
            grid_spec=pltpu.PrefetchScalarGridSpec(
                num_scalar_prefetch=0,
                grid=(nsteps,),
                in_specs=in_specs,
                out_specs=pl.BlockSpec((tm, vd_pad), lambda i: (i, 0)),
            ),
            compiler_params=pltpu.CompilerParams(
                dimension_semantics=("parallel",),
                vmem_limit_bytes=vmem_limit),
        )(xp2, w_blk, pos_flat, temp, j_mat)

    try:
        return _run(True)           # single-buffer the grid-resident operands
    except Exception:
        return _run(False)          # fallback: default (double) buffering


def _lane_pad(a, lanes):
    if a.shape[-1] == lanes:
        return a
    return jnp.pad(a, ((0, 0), (0, lanes - a.shape[-1])))


def _block_diag_weight(w, n_vars, lanes):
    # w: (patch_len, d_model) -> (V*patch_len, lanes) block-diagonal weight so a
    # single lane-dense matmul computes every var's value embedding.
    k, d = w.shape
    eye = jnp.eye(n_vars, dtype=w.dtype)
    wb = eye[:, :, None, None] * w[None, None, :, :]          # (V, V, K, D)
    wb = jnp.transpose(wb, (0, 2, 1, 3)).reshape(n_vars * k, n_vars * d)
    return _lane_pad(wb, lanes)


# ----------------------------------------------------------------------------
# Parameter / buffer construction (deterministic, matches module __init__ shapes)
# ----------------------------------------------------------------------------
def sinusoid_table(n, d):
    position = jnp.arange(n, dtype=jnp.float32)[:, None]
    div_term = jnp.exp(jnp.arange(0, d, 2, dtype=jnp.float32) * -(math.log(10000.0) / d))
    tab = jnp.zeros((n, d), dtype=jnp.float32)
    tab = tab.at[:, 0::2].set(jnp.sin(position * div_term))
    tab = tab.at[:, 1::2].set(jnp.cos(position * div_term))
    return tab


def init_params(key, d_model, patch_len):
    # nn.Linear(patch_len, d_model, bias=False): forward does x @ W.T; store W.T.
    bound = 1.0 / math.sqrt(patch_len)
    w = jax.random.uniform(key, (d_model, patch_len), jnp.float32, -bound, bound)
    return {
        "w_value": jnp.transpose(w),            # (patch_len, d_model)
        "pe": sinusoid_table(5000, d_model),    # PositionalEmbedding buffer
        # TemporalEmbedding1 with embed_type='fixed', freq='h' (fixed sinusoid tables)
        "hour_tab": sinusoid_table(24, d_model),
        "weekday_tab": sinusoid_table(7, d_model),
        "day_tab": sinusoid_table(32, d_model),
        "month_tab": sinusoid_table(13, d_model),
    }


# ----------------------------------------------------------------------------
# Forward glue (pad / unfold / reshape / time-feature tiling) + kernel call
# ----------------------------------------------------------------------------
def _prepare(params, x, x_mark, *, patch_len, stride, padding):
    B, n_vars, L = x.shape
    d_model = params["w_value"].shape[1]

    # ReplicationPad1d((0, padding)): replicate last element on the right
    if padding > 0:
        x = jnp.concatenate([x, jnp.repeat(x[:, :, -1:], padding, axis=-1)], axis=-1)

    # unfold(dim=-1, size=patch_len, step=stride) -> (B, n_vars, P, patch_len)
    Lp = x.shape[-1]
    P = (Lp - patch_len) // stride + 1
    idx = jnp.arange(P)[:, None] * stride + jnp.arange(patch_len)[None, :]
    x_unf = x[:, :, idx]                                    # (B, n_vars, P, patch_len)

    # torch.reshape (row-major) -> (B*P, n_vars, patch_len), matching the module.
    M = B * P
    xp = jnp.reshape(x_unf, (M, n_vars, patch_len))

    # PositionalEmbedding: pe[:, :x.size(1)] with x of shape (M, n_vars, patch_len)
    pos = params["pe"][:n_vars, :]                          # (n_vars, d_model)

    if x_mark is None:
        temp = jnp.zeros((M, d_model), jnp.float32)
    else:
        batch_size, seq_len, num_features = x_mark.shape
        new_seq_len = M // batch_size
        reps = new_seq_len // seq_len + 1
        xm = jnp.tile(x_mark, (1, reps, 1))[:, :new_seq_len, :]
        xm = jnp.reshape(xm, (batch_size * new_seq_len, num_features))
        # .unsqueeze(1).repeat(1, n_vars, 1): identical across vars -> compute the
        # temporal embedding once per row; broadcast over vars in the kernel (via J).
        xm_i = xm.astype(jnp.int32)                         # x_mark.long()
        temp = (params["hour_tab"][xm_i[:, 3]]
                + params["weekday_tab"][xm_i[:, 2]]
                + params["day_tab"][xm_i[:, 1]]
                + params["month_tab"][xm_i[:, 0]])          # (M, d_model)
        # TODO(synk): freq == 't' minute embedding not wired (demo uses freq='h').

    return xp, pos, temp, n_vars


def patch_embedding_inv_forward(params, x, x_mark, *, patch_len, stride, padding,
                                in_dtype=jnp.bfloat16, out_dtype=jnp.float32, tm=None):
    xp, pos, temp, n_vars = _prepare(params, x, x_mark, patch_len=patch_len,
                                     stride=stride, padding=padding)
    M = xp.shape[0]
    d_model = params["w_value"].shape[1]
    vd = n_vars * d_model
    vd_pad = _round_up(vd, 128)                             # lane-dense stores

    # Streamed operands in compact dtype; accumulation stays f32 in the kernel.
    xp2 = xp.reshape(M, n_vars * patch_len).astype(in_dtype)   # free trailing merge
    temp = temp.astype(in_dtype)
    w_blk = _block_diag_weight(params["w_value"].astype(in_dtype), n_vars, vd_pad)
    pos_flat = _lane_pad(pos.reshape(1, vd), vd_pad)            # resident, tiny, f32
    j_mat = _lane_pad(jnp.tile(jnp.eye(d_model, dtype=in_dtype), (1, n_vars)), vd_pad)

    out2 = patch_embed_matmul(xp2, w_blk, pos_flat, temp, j_mat,
                              out_dtype=out_dtype, tm=tm)
    if vd_pad != vd:
        out2 = out2[:, :vd]
    out = out2.reshape(M, n_vars, d_model)                  # free trailing split
    # nn.Dropout: identity in eval mode.
    return out, n_vars


def reference_forward(params, x, x_mark, *, patch_len, stride, padding):
    xp, pos, temp, n_vars = _prepare(params, x, x_mark, patch_len=patch_len,
                                     stride=stride, padding=padding)
    out = (jnp.einsum('mvk,kd->mvd', xp, params["w_value"],
                      precision=jax.lax.Precision.HIGHEST)
           + pos[None, :, :] + temp[:, None, :])
    return out, n_vars


if __name__ == "__main__":
    # Module hyper-params
    d_model, patch_len, stride, padding, dropout = 32, 16, 8, 8, 0.1
    # Inputs (small): x is (B, n_vars, L); x_mark is (B, seq_len, 4) for freq='h'
    B, n_vars, L = 2, 4, 64
    seq_len = L

    key = jax.random.PRNGKey(0)
    kp, kx, km = jax.random.split(key, 3)
    params = init_params(kp, d_model, patch_len)

    x = jax.random.normal(kx, (B, n_vars, L), jnp.float32)
    k0, k1, k2, k3 = jax.random.split(km, 4)
    month = jax.random.randint(k0, (B, seq_len, 1), 0, 13)
    day = jax.random.randint(k1, (B, seq_len, 1), 0, 32)
    weekday = jax.random.randint(k2, (B, seq_len, 1), 0, 7)
    hour = jax.random.randint(k3, (B, seq_len, 1), 0, 24)
    x_mark = jnp.concatenate([month, day, weekday, hour], axis=-1).astype(jnp.float32)

    ref, nv_ref = reference_forward(params, x, x_mark, patch_len=patch_len,
                                    stride=stride, padding=padding)

    # Default perf path: bf16 streamed operands / weight, f32 accumulate + output.
    out, nv = patch_embedding_inv_forward(params, x, x_mark, patch_len=patch_len,
                                          stride=stride, padding=padding)
    out = jax.block_until_ready(out)
    assert nv == nv_ref == n_vars
    assert out.shape == ref.shape == (B * 8, n_vars, d_model)   # num_patches = 8
    assert jnp.allclose(out, ref, atol=1e-1, rtol=5e-2), \
        float(jnp.max(jnp.abs(out - ref)))

    # f32 streamed path: tight check against the pure-JAX reference.
    out32, _ = patch_embedding_inv_forward(params, x, x_mark, patch_len=patch_len,
                                           stride=stride, padding=padding,
                                           in_dtype=jnp.float32)
    out32 = jax.block_until_ready(out32)
    assert out32.shape == ref.shape
    assert jnp.allclose(out32, ref, atol=1e-3, rtol=1e-3), \
        float(jnp.max(jnp.abs(out32 - ref)))

    print("KERNEL_OK")
</pallas_src>

<mosaic_0001>
module attributes {stable_mosaic.version = 11 : i64} {
  func.func @_patch_embed_kernel(%arg0: i32, %arg1: memref<16x64xbf16, #tpu.memory_space<vmem>>, %arg2: memref<64x128xbf16, #tpu.memory_space<vmem>>, %arg3: memref<1x128xf32, #tpu.memory_space<vmem>>, %arg4: memref<16x32xbf16, #tpu.memory_space<vmem>>, %arg5: memref<32x128xbf16, #tpu.memory_space<vmem>>, %arg6: memref<16x128xf32, #tpu.memory_space<vmem>>) attributes {dimension_semantics = [#tpu.dimension_semantics<parallel>], iteration_bounds = array<i64: 1>, scalar_prefetch = 0 : i64, scratch_operands = 0 : i64, tpu.core_type = #tpu.core_type<tc>, window_params = [{transform_indices = @transform_0, window_bounds = array<i64: 16, 64>}, {pipeline_mode = #tpu.pipeline_mode<synchronous>, transform_indices = @transform_1, window_bounds = array<i64: 64, 128>}, {pipeline_mode = #tpu.pipeline_mode<synchronous>, transform_indices = @transform_2, window_bounds = array<i64: 1, 128>}, {transform_indices = @transform_3, window_bounds = array<i64: 16, 32>}, {pipeline_mode = #tpu.pipeline_mode<synchronous>, transform_indices = @transform_4, window_bounds = array<i64: 32, 128>}, {transform_indices = @transform_5, window_bounds = array<i64: 16, 128>}]} {
    %c0 = arith.constant 0 : index
    %c0_0 = arith.constant 0 : index
    %0 = vector.load %arg1[%c0, %c0_0] : memref<16x64xbf16, #tpu.memory_space<vmem>>, vector<16x64xbf16>
    %c0_1 = arith.constant 0 : index
    %c0_2 = arith.constant 0 : index
    %1 = vector.load %arg2[%c0_1, %c0_2] : memref<64x128xbf16, #tpu.memory_space<vmem>>, vector<64x128xbf16>
    %cst = arith.constant dense<0.000000e+00> : vector<16x128xf32>
    %2 = tpu.matmul %0, %1, %cst {dimension_numbers = #tpu.dot_dimension_numbers<[1], [0], [0], [1], [0, 0, 1, 1], [], []>} : vector<16x64xbf16>, vector<64x128xbf16>, vector<16x128xf32> -> vector<16x128xf32>
    %c0_3 = arith.constant 0 : index
    %c0_4 = arith.constant 0 : index
    %3 = vector.load %arg4[%c0_3, %c0_4] : memref<16x32xbf16, #tpu.memory_space<vmem>>, vector<16x32xbf16>
    %c0_5 = arith.constant 0 : index
    %c0_6 = arith.constant 0 : index
    %4 = vector.load %arg5[%c0_5, %c0_6] : memref<32x128xbf16, #tpu.memory_space<vmem>>, vector<32x128xbf16>
    %cst_7 = arith.constant dense<0.000000e+00> : vector<16x128xf32>
    %5 = tpu.matmul %3, %4, %cst_7 {dimension_numbers = #tpu.dot_dimension_numbers<[1], [0], [0], [1], [0, 0, 1, 1], [], []>} : vector<16x32xbf16>, vector<32x128xbf16>, vector<16x128xf32> -> vector<16x128xf32>
    %6 = arith.addf %2, %5 : vector<16x128xf32>
    %c0_8 = arith.constant 0 : index
    %c0_9 = arith.constant 0 : index
    %7 = vector.load %arg3[%c0_8, %c0_9] : memref<1x128xf32, #tpu.memory_space<vmem>>, vector<1x128xf32>
    %8 = vector.broadcast %7 : vector<1x128xf32> to vector<16x128xf32>
    %9 = arith.addf %6, %8 : vector<16x128xf32>
    %c0_10 = arith.constant 0 : index
    %c0_11 = arith.constant 0 : index
    %10 = vector.load %arg6[%c0_10, %c0_11] : memref<16x128xf32, #tpu.memory_space<vmem>>, vector<16x128xf32>
    tpu.vector_store %arg6[%c0_10, %c0_11], %9 {strides = array<i32>} : memref<16x128xf32, #tpu.memory_space<vmem>>, vector<16x128xf32>,
    return
  }
  func.func @transform_0(%arg0: i32) -> (i32, i32) {
    %c0_i32 = arith.constant 0 : i32
    %c0_i32_0 = arith.constant 0 : i32
    return %arg0, %c0_i32 : i32, i32
  }
  func.func @transform_1(%arg0: i32) -> (i32, i32) {
    %c0_i32 = arith.constant 0 : i32
    %c0_i32_0 = arith.constant 0 : i32
    %c0_i32_1 = arith.constant 0 : i32
    return %c0_i32, %c0_i32_0 : i32, i32
  }
  func.func @transform_2(%arg0: i32) -> (i32, i32) {
    %c0_i32 = arith.constant 0 : i32
    %c0_i32_0 = arith.constant 0 : i32
    %c0_i32_1 = arith.constant 0 : i32
    return %c0_i32, %c0_i32_0 : i32, i32
  }
  func.func @transform_3(%arg0: i32) -> (i32, i32) {
    %c0_i32 = arith.constant 0 : i32
    %c0_i32_0 = arith.constant 0 : i32
    return %arg0, %c0_i32 : i32, i32
  }
  func.func @transform_4(%arg0: i32) -> (i32, i32) {
    %c0_i32 = arith.constant 0 : i32
    %c0_i32_0 = arith.constant 0 : i32
    %c0_i32_1 = arith.constant 0 : i32
    return %c0_i32, %c0_i32_0 : i32, i32
  }
  func.func @transform_5(%arg0: i32) -> (i32, i32) {
    %c0_i32 = arith.constant 0 : i32
    %c0_i32_0 = arith.constant 0 : i32
    return %arg0, %c0_i32 : i32, i32
  }
}

module attributes {stable_mosaic.version = 11 : i64} {
  func.func @_patch_embed_kernel(%arg0: i32, %arg1: memref<16x64xbf16, #tpu.memory_space<vmem>>, %arg2: memref<64x128xbf16, #tpu.memory_space<vmem>>, %arg3: memref<1x128xf32, #tpu.memory_space<vmem>>, %arg4: memref<16x32xbf16, #tpu.memory_space<vmem>>, %arg5: memref<32x128xbf16, #tpu.memory_space<vmem>>, %arg6: memref<16x128xf32, #tpu.memory_space<vmem>>) attributes {dimension_semantics = [#tpu.dimension_semantics<parallel>], iteration_bounds = array<i64: 1>, scalar_prefetch = 0 : i64, scratch_operands = 0 : i64, tpu.core_type = #tpu.core_type<tc>, window_params = [{transform_indices = @transform_0, window_bounds = array<i64: 16, 64>}, {pipeline_mode = #tpu.pipeline_mode<synchronous>, transform_indices = @transform_1, window_bounds = array<i64: 64, 128>}, {pipeline_mode = #tpu.pipeline_mode<synchronous>, transform_indices = @transform_2, window_bounds = array<i64: 1, 128>}, {transform_indices = @transform_3, window_bounds = array<i64: 16, 32>}, {pipeline_mode = #tpu.pipeline_mode<synchronous>, transform_indices = @transform_4, window_bounds = array<i64: 32, 128>}, {transform_indices = @transform_5, window_bounds = array<i64: 16, 128>}]} {
    %c0 = arith.constant 0 : index
    %c0_0 = arith.constant 0 : index
    %0 = vector.load %arg1[%c0, %c0_0] : memref<16x64xbf16, #tpu.memory_space<vmem>>, vector<16x64xbf16>
    %c0_1 = arith.constant 0 : index
    %c0_2 = arith.constant 0 : index
    %1 = vector.load %arg2[%c0_1, %c0_2] : memref<64x128xbf16, #tpu.memory_space<vmem>>, vector<64x128xbf16>
    %cst = arith.constant dense<0.000000e+00> : vector<16x128xf32>
    %2 = tpu.matmul %0, %1, %cst {dimension_numbers = #tpu.dot_dimension_numbers<[1], [0], [0], [1], [0, 0, 1, 1], [], []>} : vector<16x64xbf16>, vector<64x128xbf16>, vector<16x128xf32> -> vector<16x128xf32>
    %c0_3 = arith.constant 0 : index
    %c0_4 = arith.constant 0 : index
    %3 = vector.load %arg4[%c0_3, %c0_4] : memref<16x32xbf16, #tpu.memory_space<vmem>>, vector<16x32xbf16>
    %c0_5 = arith.constant 0 : index
    %c0_6 = arith.constant 0 : index
    %4 = vector.load %arg5[%c0_5, %c0_6] : memref<32x128xbf16, #tpu.memory_space<vmem>>, vector<32x128xbf16>
    %cst_7 = arith.constant dense<0.000000e+00> : vector<16x128xf32>
    %5 = tpu.matmul %3, %4, %cst_7 {dimension_numbers = #tpu.dot_dimension_numbers<[1], [0], [0], [1], [0, 0, 1, 1], [], []>} : vector<16x32xbf16>, vector<32x128xbf16>, vector<16x128xf32> -> vector<16x128xf32>
    %6 = arith.addf %2, %5 : vector<16x128xf32>
    %c0_8 = arith.constant 0 : index
    %c0_9 = arith.constant 0 : index
    %7 = vector.load %arg3[%c0_8, %c0_9] : memref<1x128xf32, #tpu.memory_space<vmem>>, vector<1x128xf32>
    %8 = vector.broadcast %7 : vector<1x128xf32> to vector<16x128xf32>
    %9 = arith.addf %6, %8 : vector<16x128xf32>
    %c0_10 = arith.constant 0 : index
    %c0_11 = arith.constant 0 : index
    %10 = vector.load %arg6[%c0_10, %c0_11] : memref<16x128xf32, #tpu.memory_space<vmem>>, vector<16x128xf32>
    tpu.vector_store %arg6[%c0_10, %c0_11], %9 {strides = array<i32>} : memref<16x128xf32, #tpu.memory_space<vmem>>, vector<16x128xf32>,
    return
  }
  func.func @transform_0(%arg0: i32) -> (i32, i32) {
    %c0_i32 = arith.constant 0 : i32
    %c0_i32_0 = arith.constant 0 : i32
    return %arg0, %c0_i32 : i32, i32
  }
  func.func @transform_1(%arg0: i32) -> (i32, i32) {
    %c0_i32 = arith.constant 0 : i32
    %c0_i32_0 = arith.constant 0 : i32
    %c0_i32_1 = arith.constant 0 : i32
    return %c0_i32, %c0_i32_0 : i32, i32
  }
  func.func @transform_2(%arg0: i32) -> (i32, i32) {
    %c0_i32 = arith.constant 0 : i32
    %c0_i32_0 = arith.constant 0 : i32
    %c0_i32_1 = arith.constant 0 : i32
    return %c0_i32, %c0_i32_0 : i32, i32
  }
  func.func @transform_3(%arg0: i32) -> (i32, i32) {
    %c0_i32 = arith.constant 0 : i32
    %c0_i32_0 = arith.constant 0 : i32
    return %arg0, %c0_i32 : i32, i32
  }
  func.func @transform_4(%arg0: i32) -> (i32, i32) {
    %c0_i32 = arith.constant 0 : i32
    %c0_i32_0 = arith.constant 0 : i32
    %c0_i32_1 = arith.constant 0 : i32
    return %c0_i32, %c0_i32_0 : i32, i32
  }
  func.func @transform_5(%arg0: i32) -> (i32, i32) {
    %c0_i32 = arith.constant 0 : i32
    %c0_i32_0 = arith.constant 0 : i32
    return %arg0, %c0_i32 : i32, i32
  }
}

</mosaic_0001>

<bundles_post_ra>
// kernel: tpu_custom_call.1
= control target key start
LH: loop header
LB: loop body
LE: loop exit
PB: predicated region body
PF: predicated region fallthrough
CT: control target
= control target key end

     0   :  { %10 = vsyncpa [#allocation3], 0  ;;  %s496_s0 = inlined_call_operand.hbm [shape: bf16[16,64], index: 0, kind: input, shape index: {}]   ;;  %s497_s1 = inlined_call_operand.hbm [shape: bf16[64,128], index: 1, kind: input, shape index: {}]   ;;  %s498_s2 = inlined_call_operand.vmem [shape: f32[1,128], index: 2, kind: input, shape index: {}]   ;;  %s499_s3 = inlined_call_operand.hbm [shape: bf16[16,32], index: 3, kind: input, shape index: {}]   ;;  %s500_s4 = inlined_call_operand.hbm [shape: bf16[32,128], index: 4, kind: input, shape index: {}]   ;;  %s501_s5 = inlined_call_operand.hbm [shape: f32[16,128], index: 5, kind: output, shape index: {}]  }
   0x1   :  { %11 = vsyncpa [#allocation6], 0 }
   0x2   :  { %12 = vsyncpa [#allocation9], 0 }
   0x3   :  { %13 = vsyncpa [#allocation4], 0  ;;  %s425_s18 = smov [#allocation5]   ;;  %s426_s20 = smov [#allocation2]  }
   0x4   :  { %s31_s19 = sshll.u32 %s425_s18, 4  ;;  %s19_s21 = sshll.u32 %s426_s20, 4  ;;  %s32_s19 = int_to_ptr.vmem [resolvable:$true] %s31_s19  ;;  %s20_s21 = int_to_ptr.vmem [resolvable:$true] %s19_s21 }
   0x5   :  { %s325_s22 = scalar_lea.vmem %s32_s19, 512  ;;  %p330_p1 = scmp.lt.s32.totalorder %s32_s19, %s32_s19 }
   0x6   :  { %p326_p0 = scmp.ne.s32.totalorder %s32_s19, %s325_s22  ;;  %p331_p2 = scmp.lt.s32.totalorder %s325_s22, %s325_s22 }
   0x8   :  { %p332_p3 = por %p331_p2, %p330_p1 }
   0xa   :  { %p333_p4 = pnand %p332_p3, %p326_p0 }
   0xc   :  { %336 = shalt.err (!%p333_p4)
}
   0xd   :  { %s427_s23 = smov 64   ;;  %s428_s24 = smov 4  }
   0xe   :  { %37 = dma.hbm_to_vmem [thread:$0]  %s497_s1, 512, %s32_s19, [#allocation6], %s427_s23, %s427_s23, %s428_s24  }
   0xf   :  { %s345_s27 = scalar_lea.vmem %s20_s21, 128  ;;  %p350_p6 = scmp.lt.s32.totalorder %s20_s21, %s20_s21 }
  0x10   :  { %p346_p5 = scmp.ne.s32.totalorder %s20_s21, %s345_s27  ;;  %p351_p7 = scmp.lt.s32.totalorder %s345_s27, %s345_s27 }
  0x12   :  { %p352_p8 = por %p351_p7, %p350_p6 }
  0x14   :  { %p353_p9 = pnand %p352_p8, %p346_p5 }
  0x16   :  { %356 = shalt.err (!%p353_p9)
}
  0x17   :  { %25 = dma.hbm_to_vmem [thread:$0]  %s496_s0, 128, %s20_s21, [#allocation3], %s427_s23, %s427_s23, %s428_s24  }
  0x18   :  { %s429_s30 = smov [#allocation7]   ;;  %s430_s7 = smov [#allocation8]  }
  0x19   :  { %s45_s6 = sshll.u32 %s429_s30, 4  ;;  %s57_s8 = sshll.u32 %s430_s7, 4  ;;  %s46_s6 = int_to_ptr.vmem [resolvable:$true] %s45_s6  ;;  %s58_s8 = int_to_ptr.vmem [resolvable:$true] %s57_s8 }
  0x1a   :  { %s365_s1 = scalar_lea.vmem %s46_s6, 128  ;;  %p370_p11 = scmp.lt.s32.totalorder %s46_s6, %s46_s6 }
  0x1b   :  { %p366_p10 = scmp.ne.s32.totalorder %s46_s6, %s365_s1  ;;  %p371_p12 = scmp.lt.s32.totalorder %s365_s1, %s365_s1 }
  0x1d   :  { %p372_p13 = por %p371_p12, %p370_p11 }
  0x1f   :  { %p373_p0 = pnand %p372_p13, %p366_p10 }
  0x21   :  { %376 = shalt.err (!%p373_p0)
}
  0x22   :  { %51 = dma.hbm_to_vmem [thread:$0]  %s499_s3, 128, %s46_s6, [#allocation6], %s427_s23, %s427_s23, %s428_s24  }
  0x23   :  { %s385_s0 = scalar_lea.vmem %s58_s8, 256  ;;  %p390_p2 = scmp.lt.s32.totalorder %s58_s8, %s58_s8 }
  0x24   :  { %p386_p1 = scmp.ne.s32.totalorder %s58_s8, %s385_s0  ;;  %p391_p3 = scmp.lt.s32.totalorder %s385_s0, %s385_s0 }
  0x26   :  { %p392_p4 = por %p391_p3, %p390_p2 }
  0x28   :  { %p393_p5 = pnand %p392_p4, %p386_p1 }
  0x2a   :  { %396 = shalt.err (!%p393_p5)
}
  0x2b   :  { %63 = dma.hbm_to_vmem [thread:$0]  %s500_s4, 256, %s58_s8, [#allocation9], %s427_s23, %s427_s23, %s428_s24  }
  0x2c   :  { %417 = dma.done.wait [#allocation3], 128  }
  0x2d   :  { %418 = vsyncadd [#allocation3], 4294967168 }
  0x2e   :  { %419 = dma.done.wait [#allocation6], 640  }
  0x2f   :  { %420 = vsyncadd [#allocation6], 4294966656 }
  0x30   :  { %421 = dma.done.wait [#allocation9], 256  }
  0x31   :  { %422 = vsyncadd [#allocation9], 4294967040  ;;  %v431_v0 = vmov 0.0   ;;  %vm432_vm0 = vmmov 0   ;;  %v309_v1 = vld [vmem:[#allocation5 + $0x18] sm:$0xff]   ;;  %v310_v2 = vld [vmem:[#allocation8 + $0x8] sm:$0xff]  }
  0x32   :  { %286 = vmatprep.subr.bf16.mxu1 %v431_v0  ;;  %278 = vmatprep.subr.bf16.mxu0 %v431_v0  ;;  %v311_v3 = vld [vmem:[#allocation5 + $0x10] sm:$0xff]   ;;  %v312_v4 = vld [vmem:[#allocation8] sm:$0xff]   ;;  %v314_v6 = vld [vmem:[#allocation7] sm:$0xff]   ;;  %vm110_vm1 = vcmask 261120   ;;  %vm184_vm2 = vcmask 523264   ;;  %s433_s13 = smov [#allocation10]  }
  0x33   :  { %282 = vmatprep.mubr.msk.bf16.mxu0 %vm432_vm0, %v431_v0  ;;  %294 = vmatprep.mubr.msk.bf16.mxu1 %vm432_vm0, %v431_v0  ;;  %v313_v5 = vld [vmem:[#allocation5 + $0x8] sm:$0xff]   ;;  %v315_v7 = vld [vmem:[#allocation5] sm:$0xff]   ;;  %v316_v8 = vld [vmem:[#allocation2] sm:$0xff]   ;;  %s245_s14 = sshll.u32 %s433_s13, 4  ;;  %s246_s14 = int_to_ptr.vmem [resolvable:$true] %s245_s14 }
  0x34   :  { %287 = vmatpush3.bf16.msra.mxu1 %v309_v1  ;;  %279 = vmatpush3.bf16.msra.mxu0 %v310_v2  ;;  %v269_v14 = vld [vmem:[%s498_s2] ss:$0 sm:$0xff]  ;;  %s397_s15 = scalar_lea.vmem %s246_s14, 256  ;;  %p402_p7 = scmp.lt.s32.totalorder %s246_s14, %s246_s14 }
  0x35   :  { %288 = vmatprep.subr.bf16.mxu1 %v431_v0  ;;  %280 = vmatprep.subr.bf16.mxu0 %v431_v0  ;;  %p398_p6 = scmp.ne.s32.totalorder %s246_s14, %s397_s15  ;;  %p403_p8 = scmp.lt.s32.totalorder %s397_s15, %s397_s15 }
  0x37   :  { %p404_p9 = por %p403_p8, %p402_p7 }
  0x38   :  { %289 = vmatpush3.bf16.msra.mxu1 %v311_v3  ;;  %281 = vmatpush3.bf16.msra.mxu0 %v312_v4 }
  0x39   :  { %290 = vmatprep.subr.bf16.mxu1 %v431_v0  ;;  %p405_p10 = pnand %p404_p9, %p398_p6 }
  0x3b   :  { %283 = vmatmul.mubr.msk.bf16.vlgmr.msra.gmra.mxu0 %vm110_vm1, %v314_v6 }
  0x3c   :  { %291 = vmatpush3.bf16.msra.mxu1 %v313_v5 }
  0x3d   :  { %292 = vmatprep.subr.bf16.mxu1 %v431_v0 }
  0x40   :  { %293 = vmatpush3.bf16.msra.mxu1 %v315_v7 }
  0x43   :  { %295 = vmatmul.mubr.msk.bf16.vlgmr.msra.gmra.mxu1 %vm184_vm2, %v316_v8 }
  0xfb   :  { %v148_v9 = vpop.f32.mrf.mxu0 }
  0xfd   :  { %v284_v10 = vpop.f32.mrf.mxu0 }
  0xff   :  { %v151_v11 = vpop.f32.mrf.mxu0 }
 0x101   :  { %v285_v12 = vpop.f32.mrf.mxu0 }
 0x103   :  { %v222_v13 = vpop.f32.mrf.mxu1 }
 0x104   :  { %v223_v15 = vadd.f32 %v222_v13, %v148_v9 }
 0x105   :  { %v296_v16 = vpop.f32.mrf.mxu1 }
 0x106   :  { %v236_v17 = vadd.f32 %v269_v14, %v223_v15 }
 0x107   :  { %v225_v18 = vpop.f32.mrf.mxu1 }
 0x108   :  { %238 = vst [vmem:[#allocation10] sm:$0xff] %v236_v17  ;;  %v226_v19 = vadd.f32 %v225_v18, %v151_v11 }
 0x109   :  { %v297_v20 = vpop.f32.mrf.mxu1 }
 0x10a   :  { %v237_v21 = vadd.f32 %v269_v14, %v226_v19 }
 0x10c   :  { %239 = vst [vmem:[#allocation10 + $0x8] sm:$0xff] %v237_v21 }
 0x10d   :  { %408 = shalt.err (!%p405_p10)
}
 0x10e   :  { %s434_s2 = smov 128   ;;  %s435_s16 = smov 8  }
 0x10f   :  { %251 = dma.vmem_to_hbm [thread:$0]  %s246_s14, 256, %s501_s5, [#allocation4], %s434_s2, %s434_s2, %s435_s16  }
 0x110   :  { %423 = dma.done.wait [#allocation4], 256  }
 0x111   :  { %424 = vsyncadd [#allocation4], 4294967040 }
 0x112   :  { %255 = vsyncpa [#allocation3], 1 }
 0x113   :  { %256 = vsyncpa [#allocation6], 1 }
 0x114   :  { %257 = vsyncpa [#allocation9], 1 }
 0x115   :  { %258 = vsyncpa [#allocation4], 1 }

// kernel: tpu_custom_call.1
= control target key start
LH: loop header
LB: loop body
LE: loop exit
PB: predicated region body
PF: predicated region fallthrough
CT: control target
= control target key end

     0   :  { %10 = vsyncpa [#allocation3], 0  ;;  %s496_s0 = inlined_call_operand.hbm [shape: bf16[16,64], index: 0, kind: input, shape index: {}]   ;;  %s497_s1 = inlined_call_operand.hbm [shape: bf16[64,128], index: 1, kind: input, shape index: {}]   ;;  %s498_s2 = inlined_call_operand.vmem [shape: f32[1,128], index: 2, kind: input, shape index: {}]   ;;  %s499_s3 = inlined_call_operand.hbm [shape: bf16[16,32], index: 3, kind: input, shape index: {}]   ;;  %s500_s4 = inlined_call_operand.hbm [shape: bf16[32,128], index: 4, kind: input, shape index: {}]   ;;  %s501_s5 = inlined_call_operand.hbm [shape: f32[16,128], index: 5, kind: output, shape index: {}]  }
   0x1   :  { %11 = vsyncpa [#allocation6], 0 }
   0x2   :  { %12 = vsyncpa [#allocation9], 0 }
   0x3   :  { %13 = vsyncpa [#allocation4], 0  ;;  %s425_s18 = smov [#allocation5]   ;;  %s426_s20 = smov [#allocation2]  }
   0x4   :  { %s31_s19 = sshll.u32 %s425_s18, 4  ;;  %s19_s21 = sshll.u32 %s426_s20, 4  ;;  %s32_s19 = int_to_ptr.vmem [resolvable:$true] %s31_s19  ;;  %s20_s21 = int_to_ptr.vmem [resolvable:$true] %s19_s21 }
   0x5   :  { %s325_s22 = scalar_lea.vmem %s32_s19, 512  ;;  %p330_p1 = scmp.lt.s32.totalorder %s32_s19, %s32_s19 }
   0x6   :  { %p326_p0 = scmp.ne.s32.totalorder %s32_s19, %s325_s22  ;;  %p331_p2 = scmp.lt.s32.totalorder %s325_s22, %s325_s22 }
   0x8   :  { %p332_p3 = por %p331_p2, %p330_p1 }
   0xa   :  { %p333_p4 = pnand %p332_p3, %p326_p0 }
   0xc   :  { %336 = shalt.err (!%p333_p4)
}
   0xd   :  { %s427_s23 = smov 64   ;;  %s428_s24 = smov 4  }
   0xe   :  { %37 = dma.hbm_to_vmem [thread:$0]  %s497_s1, 512, %s32_s19, [#allocation6], %s427_s23, %s427_s23, %s428_s24  }
   0xf   :  { %s345_s27 = scalar_lea.vmem %s20_s21, 128  ;;  %p350_p6 = scmp.lt.s32.totalorder %s20_s21, %s20_s21 }
  0x10   :  { %p346_p5 = scmp.ne.s32.totalorder %s20_s21, %s345_s27  ;;  %p351_p7 = scmp.lt.s32.totalorder %s345_s27, %s345_s27 }
  0x12   :  { %p352_p8 = por %p351_p7, %p350_p6 }
  0x14   :  { %p353_p9 = pnand %p352_p8, %p346_p5 }
  0x16   :  { %356 = shalt.err (!%p353_p9)
}
  0x17   :  { %25 = dma.hbm_to_vmem [thread:$0]  %s496_s0, 128, %s20_s21, [#allocation3], %s427_s23, %s427_s23, %s428_s24  }
  0x18   :  { %s429_s30 = smov [#allocation7]   ;;  %s430_s7 = smov [#allocation8]  }
  0x19   :  { %s45_s6 = sshll.u32 %s429_s30, 4  ;;  %s57_s8 = sshll.u32 %s430_s7, 4  ;;  %s46_s6 = int_to_ptr.vmem [resolvable:$true] %s45_s6  ;;  %s58_s8 = int_to_ptr.vmem [resolvable:$true] %s57_s8 }
  0x1a   :  { %s365_s1 = scalar_lea.vmem %s46_s6, 128  ;;  %p370_p11 = scmp.lt.s32.totalorder %s46_s6, %s46_s6 }
  0x1b   :  { %p366_p10 = scmp.ne.s32.totalorder %s46_s6, %s365_s1  ;;  %p371_p12 = scmp.lt.s32.totalorder %s365_s1, %s365_s1 }
  0x1d   :  { %p372_p13 = por %p371_p12, %p370_p11 }
  0x1f   :  { %p373_p0 = pnand %p372_p13, %p366_p10 }
  0x21   :  { %376 = shalt.err (!%p373_p0)
}
  0x22   :  { %51 = dma.hbm_to_vmem [thread:$0]  %s499_s3, 128, %s46_s6, [#allocation6], %s427_s23, %s427_s23, %s428_s24  }
  0x23   :  { %s385_s0 = scalar_lea.vmem %s58_s8, 256  ;;  %p390_p2 = scmp.lt.s32.totalorder %s58_s8, %s58_s8 }
  0x24   :  { %p386_p1 = scmp.ne.s32.totalorder %s58_s8, %s385_s0  ;;  %p391_p3 = scmp.lt.s32.totalorder %s385_s0, %s385_s0 }
  0x26   :  { %p392_p4 = por %p391_p3, %p390_p2 }
  0x28   :  { %p393_p5 = pnand %p392_p4, %p386_p1 }
  0x2a   :  { %396 = shalt.err (!%p393_p5)
}
  0x2b   :  { %63 = dma.hbm_to_vmem [thread:$0]  %s500_s4, 256, %s58_s8, [#allocation9], %s427_s23, %s427_s23, %s428_s24  }
  0x2c   :  { %417 = dma.done.wait [#allocation3], 128  }
  0x2d   :  { %418 = vsyncadd [#allocation3], 4294967168 }
  0x2e   :  { %419 = dma.done.wait [#allocation6], 640  }
  0x2f   :  { %420 = vsyncadd [#allocation6], 4294966656 }
  0x30   :  { %421 = dma.done.wait [#allocation9], 256  }
  0x31   :  { %422 = vsyncadd [#allocation9], 4294967040  ;;  %v431_v0 = vmov 0.0   ;;  %vm432_vm0 = vmmov 0   ;;  %v309_v1 = vld [vmem:[#allocation5 + $0x18] sm:$0xff]   ;;  %v310_v2 = vld [vmem:[#allocation8 + $0x8] sm:$0xff]  }
  0x32   :  { %286 = vmatprep.subr.bf16.mxu1 %v431_v0  ;;  %278 = vmatprep.subr.bf16.mxu0 %v431_v0  ;;  %v311_v3 = vld [vmem:[#allocation5 + $0x10] sm:$0xff]   ;;  %v312_v4 = vld [vmem:[#allocation8] sm:$0xff]   ;;  %v314_v6 = vld [vmem:[#allocation7] sm:$0xff]   ;;  %vm110_vm1 = vcmask 261120   ;;  %vm184_vm2 = vcmask 523264   ;;  %s433_s13 = smov [#allocation10]  }
  0x33   :  { %282 = vmatprep.mubr.msk.bf16.mxu0 %vm432_vm0, %v431_v0  ;;  %294 = vmatprep.mubr.msk.bf16.mxu1 %vm432_vm0, %v431_v0  ;;  %v313_v5 = vld [vmem:[#allocation5 + $0x8] sm:$0xff]   ;;  %v315_v7 = vld [vmem:[#allocation5] sm:$0xff]   ;;  %v316_v8 = vld [vmem:[#allocation2] sm:$0xff]   ;;  %s245_s14 = sshll.u32 %s433_s13, 4  ;;  %s246_s14 = int_to_ptr.vmem [resolvable:$true] %s245_s14 }
  0x34   :  { %287 = vmatpush3.bf16.msra.mxu1 %v309_v1  ;;  %279 = vmatpush3.bf16.msra.mxu0 %v310_v2  ;;  %v269_v14 = vld [vmem:[%s498_s2] ss:$0 sm:$0xff]  ;;  %s397_s15 = scalar_lea.vmem %s246_s14, 256  ;;  %p402_p7 = scmp.lt.s32.totalorder %s246_s14, %s246_s14 }
  0x35   :  { %288 = vmatprep.subr.bf16.mxu1 %v431_v0  ;;  %280 = vmatprep.subr.bf16.mxu0 %v431_v0  ;;  %p398_p6 = scmp.ne.s32.totalorder %s246_s14, %s397_s15  ;;  %p403_p8 = scmp.lt.s32.totalorder %s397_s15, %s397_s15 }
  0x37   :  { %p404_p9 = por %p403_p8, %p402_p7 }
  0x38   :  { %289 = vmatpush3.bf16.msra.mxu1 %v311_v3  ;;  %281 = vmatpush3.bf16.msra.mxu0 %v312_v4 }
  0x39   :  { %290 = vmatprep.subr.bf16.mxu1 %v431_v0  ;;  %p405_p10 = pnand %p404_p9, %p398_p6 }
  0x3b   :  { %283 = vmatmul.mubr.msk.bf16.vlgmr.msra.gmra.mxu0 %vm110_vm1, %v314_v6 }
  0x3c   :  { %291 = vmatpush3.bf16.msra.mxu1 %v313_v5 }
  0x3d   :  { %292 = vmatprep.subr.bf16.mxu1 %v431_v0 }
  0x40   :  { %293 = vmatpush3.bf16.msra.mxu1 %v315_v7 }
  0x43   :  { %295 = vmatmul.mubr.msk.bf16.vlgmr.msra.gmra.mxu1 %vm184_vm2, %v316_v8 }
  0xfb   :  { %v148_v9 = vpop.f32.mrf.mxu0 }
  0xfd   :  { %v284_v10 = vpop.f32.mrf.mxu0 }
  0xff   :  { %v151_v11 = vpop.f32.mrf.mxu0 }
 0x101   :  { %v285_v12 = vpop.f32.mrf.mxu0 }
 0x103   :  { %v222_v13 = vpop.f32.mrf.mxu1 }
 0x104   :  { %v223_v15 = vadd.f32 %v222_v13, %v148_v9 }
 0x105   :  { %v296_v16 = vpop.f32.mrf.mxu1 }
 0x106   :  { %v236_v17 = vadd.f32 %v269_v14, %v223_v15 }
 0x107   :  { %v225_v18 = vpop.f32.mrf.mxu1 }
 0x108   :  { %238 = vst [vmem:[#allocation10] sm:$0xff] %v236_v17  ;;  %v226_v19 = vadd.f32 %v225_v18, %v151_v11 }
 0x109   :  { %v297_v20 = vpop.f32.mrf.mxu1 }
 0x10a   :  { %v237_v21 = vadd.f32 %v269_v14, %v226_v19 }
 0x10c   :  { %239 = vst [vmem:[#allocation10 + $0x8] sm:$0xff] %v237_v21 }
 0x10d   :  { %408 = shalt.err (!%p405_p10)
}
 0x10e   :  { %s434_s2 = smov 128   ;;  %s435_s16 = smov 8  }
 0x10f   :  { %251 = dma.vmem_to_hbm [thread:$0]  %s246_s14, 256, %s501_s5, [#allocation4], %s434_s2, %s434_s2, %s435_s16  }
 0x110   :  { %423 = dma.done.wait [#allocation4], 256  }
 0x111   :  { %424 = vsyncadd [#allocation4], 4294967040 }
 0x112   :  { %255 = vsyncpa [#allocation3], 1 }
 0x113   :  { %256 = vsyncpa [#allocation6], 1 }
 0x114   :  { %257 = vsyncpa [#allocation9], 1 }
 0x115   :  { %258 = vsyncpa [#allocation4], 1 }

</bundles_post_ra>
